<compile_context>
chip_gen: v6e
topology: v6e:2x2x1
jax: 0.10.0
libtpu: 0.0.40
codegen_flags: <defaults>
</compile_context>

<pallas_src>
import functools

import jax
import jax.numpy as jnp
import numpy as np
from jax import lax
from jax.experimental import pallas as pl
from jax.experimental.pallas import tpu as pltpu


def _round_up(x, m):
    return ((x + m - 1) // m) * m


def actor_kernel(x_ref, w1_ref, w2_ref, w3t_ref, vec_ref, b3c_ref, out_ref, *,
                 l1_dim, l2_dim, action_dim, transpose_out):
    """One batch tile: fc1+LN+relu -> fc2+LN+relu -> fc3+tanh."""
    eps = 1e-5
    mm_dtype = w1_ref.dtype   # matmul input dtype (f32 or bf16)

    # Packed small vectors (resident, f32):
    #   rows 0..2 = b1, gamma1, beta1 ; rows 3..5 = b2, gamma2, beta2 ; row 6 = b3
    vecs = vec_ref[...]
    b1, g1, be1 = vecs[0:1, :l1_dim], vecs[1:2, :l1_dim], vecs[2:3, :l1_dim]
    b2, g2, be2 = vecs[3:4, :l2_dim], vecs[4:5, :l2_dim], vecs[5:6, :l2_dim]

    def ln_relu(h, gamma, beta, dim):
        # LayerNorm stats on the (otherwise idle) MXU instead of XLU cross-lane
        # reductions: dotting against a (dim, dim) ones/dim matrix yields the
        # mean / E[x^2] already broadcast across lanes.  var = E[x^2] - mu^2.
        # (O(dim^2) MXU flops per row - cheap at these hidden sizes; re-check
        #  the tradeoff if hidden dims grow into the many-hundreds on v5e.)
        ones_nn = jnp.full((dim, dim), 1.0 / dim, dtype=jnp.float32)
        mu = jnp.dot(h, ones_nn, preferred_element_type=jnp.float32)
        ex2 = jnp.dot(h * h, ones_nn, preferred_element_type=jnp.float32)
        var = ex2 - mu * mu
        y = (h - mu) * lax.rsqrt(var + eps) * gamma + beta
        return jnp.maximum(y, 0.0)

    # State is streamed in its stored dtype; any low-precision cast happens
    # here, per tile, hidden under the DMA pipeline (no wrapper-side pass).
    x = x_ref[...].astype(mm_dtype)

    # fc1 -> LayerNorm -> relu   (MXU dot, f32 accumulation; LN math in f32)
    h1 = jnp.dot(x, w1_ref[...], preferred_element_type=jnp.float32) + b1
    h1 = ln_relu(h1, g1, be1, l1_dim)

    # fc2 -> LayerNorm -> relu
    h2 = jnp.dot(h1.astype(mm_dtype), w2_ref[...],
                 preferred_element_type=jnp.float32) + b2
    h2 = ln_relu(h2, g2, be2, l2_dim)

    # action_optimal -> tanh.  w3 is passed transposed: (action_dim, l2_dim).
    h2s = h2.astype(mm_dtype)
    if transpose_out:
        # Lane-dense path: produce (action_dim, tile_b) directly so the store
        # uses full 128-lane vst instead of 4/128 masked partial stores.
        a = lax.dot_general(w3t_ref[...], h2s, (((1,), (1,)), ((), ())),
                            preferred_element_type=jnp.float32)
        a = jnp.tanh(a + b3c_ref[...])                 # (A,1) bias broadcast
        out_ref[...] = a.astype(out_ref.dtype)         # (A, tile_b) store
    else:
        b3 = vecs[6:7, :action_dim]
        a = lax.dot_general(h2s, w3t_ref[...], (((1,), (1,)), ((), ())),
                            preferred_element_type=jnp.float32)
        out_ref[...] = jnp.tanh(a + b3).astype(out_ref.dtype)


def actor_forward(state, params, *, tile_b=None, stream_dtype=None):
    """state: (B, state_dim).  params: dict (see init_actor_params).

    Returns (B, action_dim) float32 actions.
    """
    B, state_dim = state.shape
    l1_dim = params["w1"].shape[1]
    l2_dim = params["w2"].shape[1]
    action_dim = params["w3"].shape[1]

    # Optional reduced-precision matmul path (near-neutral here; kept as an
    # option only).  Only the tiny weights are cast in the wrapper; the state
    # is streamed as stored and cast inside the kernel.
    if stream_dtype is None:
        stream_dtype = state.dtype
    w1 = params["w1"].astype(stream_dtype)
    w2 = params["w2"].astype(stream_dtype)
    w3t = params["w3"].T.astype(stream_dtype)          # (action_dim, l2_dim)
    b3col = params["b3"].reshape(-1, 1).astype(jnp.float32)  # (action_dim, 1)

    # Pack the seven (1, N) bias / LayerNorm vectors into a single (8, Hmax)
    # f32 operand -> one resident BlockSpec / one DMA instead of seven.
    hmax = max(l1_dim, l2_dim, action_dim)

    def padrow(v):
        v = v.reshape(1, -1).astype(jnp.float32)
        return jnp.pad(v, ((0, 0), (0, hmax - v.shape[-1])))

    vecs = jnp.concatenate(
        [padrow(params["b1"]), padrow(params["g1"]), padrow(params["be1"]),
         padrow(params["b2"]), padrow(params["g2"]), padrow(params["be2"]),
         padrow(params["b3"]), jnp.zeros((1, hmax), jnp.float32)], axis=0)

    in_itemsize = jnp.dtype(state.dtype).itemsize
    w_itemsize = jnp.dtype(stream_dtype).itemsize
    param_bytes = ((w1.size + w2.size + w3t.size) * w_itemsize
                   + (vecs.size + b3col.size) * 4)

    # ---- batch tile selection --------------------------------------------
    # Big tiles amortize the ~0.35 us / grid-step overhead (sweet spot
    # 2048-8192 rows at these layer sizes).
    if tile_b is None:
        tile_b = 4096
    tile_b = int(tile_b)
    # Keep >= 2 grid steps so the "parallel" batch axis can shard across
    # v7x's two TensorCores.
    tile_b = max(8, min(tile_b, _round_up(pl.cdiv(B, 2), 8)))
    # VMEM budget: 2 pipeline buffers for streamed state + output plus rough
    # headroom for intermediate activations; stay well under the 32 MiB
    # scoped limit (v7x has only 64 MiB physical VMEM per TensorCore).
    budget = 24 * 1024 * 1024
    per_row = (2 * (state_dim * in_itemsize + action_dim * 4)
               + 4 * (l1_dim + l2_dim) * 4)
    max_rows = max(8, int((budget - param_bytes) // per_row))
    tile_b = min(tile_b, max_rows)
    # 128-multiple tiles enable the lane-dense (transposed) output store.
    if tile_b >= 128:
        tile_b = (tile_b // 128) * 128
    else:
        tile_b = max(8, _round_up(tile_b, 8))
    transpose_out = (tile_b % 128 == 0)

    grid = (pl.cdiv(B, tile_b),)        # partial last block handled by Pallas

    kernel = functools.partial(actor_kernel, l1_dim=l1_dim, l2_dim=l2_dim,
                               action_dim=action_dim,
                               transpose_out=transpose_out)

    cost = pl.CostEstimate(
        flops=2 * B * (state_dim * l1_dim + l1_dim * l2_dim
                       + l2_dim * action_dim
                       + 2 * l1_dim * l1_dim + 2 * l2_dim * l2_dim),
        transcendentals=B * (action_dim + 2),     # tanh + 2 rsqrt per row
        bytes_accessed=B * state_dim * in_itemsize
                       + B * action_dim * 4 + param_bytes,
    )

    if transpose_out:
        out_shape = jax.ShapeDtypeStruct((action_dim, B), jnp.float32)
        out_spec = pl.BlockSpec((action_dim, tile_b), lambda i: (0, i))
    else:
        out_shape = jax.ShapeDtypeStruct((B, action_dim), jnp.float32)
        out_spec = pl.BlockSpec((tile_b, action_dim), lambda i: (i, 0))

    out = pl.pallas_call(
        kernel,
        out_shape=out_shape,
        grid=grid,
        in_specs=[
            pl.BlockSpec((tile_b, state_dim), lambda i: (i, 0)),    # streamed
            pl.BlockSpec((state_dim, l1_dim), lambda i: (0, 0)),    # resident
            pl.BlockSpec((l1_dim, l2_dim), lambda i: (0, 0)),       # resident
            pl.BlockSpec((action_dim, l2_dim), lambda i: (0, 0)),   # resident (w3^T)
            pl.BlockSpec((8, hmax), lambda i: (0, 0)),              # packed vecs
            pl.BlockSpec((action_dim, 1), lambda i: (0, 0)),        # b3 column
        ],
        out_specs=out_spec,
        compiler_params=pltpu.CompilerParams(
            dimension_semantics=("parallel",),      # megacore on v7x
            vmem_limit_bytes=32 * 1024 * 1024,      # safe on v5e/v6e/v7x
        ),
        cost_estimate=cost,
    )(state, w1, w2, w3t, vecs, b3col)

    # (action_dim, B) -> (B, action_dim): tiny wrapper transpose, far cheaper
    # than the masked partial stores it replaces inside the kernel.
    return out.T if transpose_out else out


def init_actor_params(key, state_dim, l1_dim, l2_dim, action_dim):
    """Deterministic init mirroring Actor.build_network / init_layer.

    PyTorch Linear weight has shape (out, in); init_layer uses
    bound = 1/sqrt(weight.size()[0]) = 1/sqrt(out_features) for fc1/fc2 and
    0.003 for the output layer.  Weights are stored transposed (in, out) so
    the kernel computes a plain `x @ W`.  LayerNorm: gamma=1, beta=0.
    """
    k = jax.random.split(key, 6)
    b1 = 1.0 / np.sqrt(l1_dim)
    b2 = 1.0 / np.sqrt(l2_dim)
    b3 = 0.003
    u = lambda kk, shp, bnd: jax.random.uniform(kk, shp, jnp.float32, -bnd, bnd)
    return {
        "w1": u(k[0], (state_dim, l1_dim), b1),
        "b1": u(k[1], (1, l1_dim), b1),
        "g1": jnp.ones((1, l1_dim), jnp.float32),
        "be1": jnp.zeros((1, l1_dim), jnp.float32),
        "w2": u(k[2], (l1_dim, l2_dim), b2),
        "b2": u(k[3], (1, l2_dim), b2),
        "g2": jnp.ones((1, l2_dim), jnp.float32),
        "be2": jnp.zeros((1, l2_dim), jnp.float32),
        "w3": u(k[4], (l2_dim, action_dim), b3),
        "b3": u(k[5], (1, action_dim), b3),
    }


def actor_forward_ref(state, p):
    """Pure-JAX f32 reference for correctness checking."""
    eps = 1e-5

    def ln(h, g, b):
        mu = jnp.mean(h, axis=-1, keepdims=True)
        var = jnp.mean((h - mu) ** 2, axis=-1, keepdims=True)
        return (h - mu) / jnp.sqrt(var + eps) * g + b

    h = jax.nn.relu(ln(state @ p["w1"] + p["b1"], p["g1"], p["be1"]))
    h = jax.nn.relu(ln(h @ p["w2"] + p["b2"], p["g2"], p["be2"]))
    return jnp.tanh(h @ p["w3"] + p["b3"])


if __name__ == "__main__":
    key = jax.random.PRNGKey(0)
    kp, kx, kx2 = jax.random.split(key, 3)

    state_dim, l1_dim, l2_dim, action_dim = 16, 32, 32, 4
    params = init_actor_params(kp, state_dim, l1_dim, l2_dim, action_dim)

    # Small batch, not a tile multiple -> exercises the partial last block and
    # the row-major (small-tile) output path.  No wrapper-side padding used.
    state = jax.random.normal(kx, (20, state_dim), jnp.float32)
    ref = actor_forward_ref(state, params)

    out_auto = jax.block_until_ready(actor_forward(state, params))      # auto tile
    np.testing.assert_allclose(np.asarray(out_auto), np.asarray(ref),
                               rtol=2e-5, atol=2e-5)

    out_small = jax.block_until_ready(actor_forward(state, params, tile_b=8))
    np.testing.assert_allclose(np.asarray(out_small), np.asarray(ref),
                               rtol=2e-5, atol=2e-5)

    # Optional bf16 matmul path (near-neutral perf; looser tolerance because
    # the inter-layer activations are also cast to bf16 before each dot).
    out_bf16 = jax.block_until_ready(
        actor_forward(state, params, stream_dtype=jnp.bfloat16))
    np.testing.assert_allclose(np.asarray(out_bf16), np.asarray(ref),
                               rtol=5e-2, atol=5e-2)

    # Larger batch -> 128-row tiles -> lane-dense transposed output path,
    # still with a partial last block (300 = 2*128 + 44).
    state2 = jax.random.normal(kx2, (300, state_dim), jnp.float32)
    ref2 = actor_forward_ref(state2, params)
    out2 = jax.block_until_ready(actor_forward(state2, params))
    np.testing.assert_allclose(np.asarray(out2), np.asarray(ref2),
                               rtol=2e-5, atol=2e-5)

    print("KERNEL_OK")
</pallas_src>

<mosaic_0001>
module attributes {stable_mosaic.version = 11 : i64} {
  func.func @actor_kernel(%arg0: i32, %arg1: memref<16x16xf32, #tpu.memory_space<vmem>>, %arg2: memref<16x32xf32, #tpu.memory_space<vmem>>, %arg3: memref<32x32xf32, #tpu.memory_space<vmem>>, %arg4: memref<4x32xf32, #tpu.memory_space<vmem>>, %arg5: memref<8x32xf32, #tpu.memory_space<vmem>>, %arg6: memref<4x1xf32, #tpu.memory_space<vmem>>, %arg7: memref<16x4xf32, #tpu.memory_space<vmem>>) attributes {dimension_semantics = [#tpu.dimension_semantics<parallel>], iteration_bounds = array<i64: 2>, scalar_prefetch = 0 : i64, scratch_operands = 0 : i64, tpu.core_type = #tpu.core_type<tc>, window_params = [{transform_indices = @transform_0, window_bounds = array<i64: 16, 16>}, {pipeline_mode = #tpu.pipeline_mode<synchronous>, transform_indices = @transform_1, window_bounds = array<i64: 16, 32>}, {pipeline_mode = #tpu.pipeline_mode<synchronous>, transform_indices = @transform_2, window_bounds = array<i64: 32, 32>}, {pipeline_mode = #tpu.pipeline_mode<synchronous>, transform_indices = @transform_3, window_bounds = array<i64: 4, 32>}, {pipeline_mode = #tpu.pipeline_mode<synchronous>, transform_indices = @transform_4, window_bounds = array<i64: 8, 32>}, {pipeline_mode = #tpu.pipeline_mode<synchronous>, transform_indices = @transform_5, window_bounds = array<i64: 4, 1>}, {transform_indices = @transform_6, window_bounds = array<i64: 16, 4>}]} {
    %c0 = arith.constant 0 : index
    %c0_0 = arith.constant 0 : index
    %0 = vector.load %arg5[%c0, %c0_0] : memref<8x32xf32, #tpu.memory_space<vmem>>, vector<8x32xf32>
    %1 = vector.extract_strided_slice %0 {offsets = [0, 0], sizes = [1, 32], strides = [1, 1]} : vector<8x32xf32> to vector<1x32xf32>
    %2 = vector.extract_strided_slice %0 {offsets = [1, 0], sizes = [1, 32], strides = [1, 1]} : vector<8x32xf32> to vector<1x32xf32>
    %3 = vector.extract_strided_slice %0 {offsets = [2, 0], sizes = [1, 32], strides = [1, 1]} : vector<8x32xf32> to vector<1x32xf32>
    %4 = vector.extract_strided_slice %0 {offsets = [3, 0], sizes = [1, 32], strides = [1, 1]} : vector<8x32xf32> to vector<1x32xf32>
    %5 = vector.extract_strided_slice %0 {offsets = [4, 0], sizes = [1, 32], strides = [1, 1]} : vector<8x32xf32> to vector<1x32xf32>
    %6 = vector.extract_strided_slice %0 {offsets = [5, 0], sizes = [1, 32], strides = [1, 1]} : vector<8x32xf32> to vector<1x32xf32>
    %c0_1 = arith.constant 0 : index
    %c0_2 = arith.constant 0 : index
    %7 = vector.load %arg1[%c0_1, %c0_2] : memref<16x16xf32, #tpu.memory_space<vmem>>, vector<16x16xf32>
    %c0_3 = arith.constant 0 : index
    %c0_4 = arith.constant 0 : index
    %8 = vector.load %arg2[%c0_3, %c0_4] : memref<16x32xf32, #tpu.memory_space<vmem>>, vector<16x32xf32>
    %cst = arith.constant dense<0.000000e+00> : vector<16x32xf32>
    %9 = tpu.matmul %7, %8, %cst {dimension_numbers = #tpu.dot_dimension_numbers<[1], [0], [0], [1], [0, 0, 1, 1], [], []>} : vector<16x16xf32>, vector<16x32xf32>, vector<16x32xf32> -> vector<16x32xf32>
    %10 = vector.broadcast %1 : vector<1x32xf32> to vector<16x32xf32>
    %11 = arith.addf %9, %10 : vector<16x32xf32>
    %cst_5 = arith.constant 3.125000e-02 : f32
    %12 = vector.broadcast %cst_5 : f32 to vector<32x32xf32>
    %cst_6 = arith.constant dense<0.000000e+00> : vector<16x32xf32>
    %13 = tpu.matmul %11, %12, %cst_6 {dimension_numbers = #tpu.dot_dimension_numbers<[1], [0], [0], [1], [0, 0, 1, 1], [], []>} : vector<16x32xf32>, vector<32x32xf32>, vector<16x32xf32> -> vector<16x32xf32>
    %14 = arith.mulf %11, %11 : vector<16x32xf32>
    %cst_7 = arith.constant dense<0.000000e+00> : vector<16x32xf32>
    %15 = tpu.matmul %14, %12, %cst_7 {dimension_numbers = #tpu.dot_dimension_numbers<[1], [0], [0], [1], [0, 0, 1, 1], [], []>} : vector<16x32xf32>, vector<32x32xf32>, vector<16x32xf32> -> vector<16x32xf32>
    %16 = arith.mulf %13, %13 : vector<16x32xf32>
    %17 = arith.subf %15, %16 : vector<16x32xf32>
    %18 = arith.subf %11, %13 : vector<16x32xf32>
    %cst_8 = arith.constant 9.99999974E-6 : f32
    %19 = vector.broadcast %cst_8 : f32 to vector<16x32xf32>
    %20 = arith.addf %17, %19 : vector<16x32xf32>
    %21 = math.rsqrt %20 : vector<16x32xf32>
    %22 = arith.mulf %18, %21 : vector<16x32xf32>
    %23 = vector.broadcast %2 : vector<1x32xf32> to vector<16x32xf32>
    %24 = arith.mulf %22, %23 : vector<16x32xf32>
    %25 = vector.broadcast %3 : vector<1x32xf32> to vector<16x32xf32>
    %26 = arith.addf %24, %25 : vector<16x32xf32>
    %cst_9 = arith.constant 0.000000e+00 : f32
    %27 = vector.broadcast %cst_9 : f32 to vector<16x32xf32>
    %28 = arith.maximumf %26, %27 : vector<16x32xf32>
    %c0_10 = arith.constant 0 : index
    %c0_11 = arith.constant 0 : index
    %29 = vector.load %arg3[%c0_10, %c0_11] : memref<32x32xf32, #tpu.memory_space<vmem>>, vector<32x32xf32>
    %cst_12 = arith.constant dense<0.000000e+00> : vector<16x32xf32>
    %30 = tpu.matmul %28, %29, %cst_12 {dimension_numbers = #tpu.dot_dimension_numbers<[1], [0], [0], [1], [0, 0, 1, 1], [], []>} : vector<16x32xf32>, vector<32x32xf32>, vector<16x32xf32> -> vector<16x32xf32>
    %31 = vector.broadcast %4 : vector<1x32xf32> to vector<16x32xf32>
    %32 = arith.addf %30, %31 : vector<16x32xf32>
    %cst_13 = arith.constant 3.125000e-02 : f32
    %33 = vector.broadcast %cst_13 : f32 to vector<32x32xf32>
    %cst_14 = arith.constant dense<0.000000e+00> : vector<16x32xf32>
    %34 = tpu.matmul %32, %33, %cst_14 {dimension_numbers = #tpu.dot_dimension_numbers<[1], [0], [0], [1], [0, 0, 1, 1], [], []>} : vector<16x32xf32>, vector<32x32xf32>, vector<16x32xf32> -> vector<16x32xf32>
    %35 = arith.mulf %32, %32 : vector<16x32xf32>
    %cst_15 = arith.constant dense<0.000000e+00> : vector<16x32xf32>
    %36 = tpu.matmul %35, %33, %cst_15 {dimension_numbers = #tpu.dot_dimension_numbers<[1], [0], [0], [1], [0, 0, 1, 1], [], []>} : vector<16x32xf32>, vector<32x32xf32>, vector<16x32xf32> -> vector<16x32xf32>
    %37 = arith.mulf %34, %34 : vector<16x32xf32>
    %38 = arith.subf %36, %37 : vector<16x32xf32>
    %39 = arith.subf %32, %34 : vector<16x32xf32>
    %cst_16 = arith.constant 9.99999974E-6 : f32
    %40 = vector.broadcast %cst_16 : f32 to vector<16x32xf32>
    %41 = arith.addf %38, %40 : vector<16x32xf32>
    %42 = math.rsqrt %41 : vector<16x32xf32>
    %43 = arith.mulf %39, %42 : vector<16x32xf32>
    %44 = vector.broadcast %5 : vector<1x32xf32> to vector<16x32xf32>
    %45 = arith.mulf %43, %44 : vector<16x32xf32>
    %46 = vector.broadcast %6 : vector<1x32xf32> to vector<16x32xf32>
    %47 = arith.addf %45, %46 : vector<16x32xf32>
    %cst_17 = arith.constant 0.000000e+00 : f32
    %48 = vector.broadcast %cst_17 : f32 to vector<16x32xf32>
    %49 = arith.maximumf %47, %48 : vector<16x32xf32>
    %50 = vector.extract_strided_slice %0 {offsets = [6, 0], sizes = [1, 4], strides = [1, 1]} : vector<8x32xf32> to vector<1x4xf32>
    %c0_18 = arith.constant 0 : index
    %c0_19 = arith.constant 0 : index
    %51 = vector.load %arg4[%c0_18, %c0_19] : memref<4x32xf32, #tpu.memory_space<vmem>>, vector<4x32xf32>
    %cst_20 = arith.constant dense<0.000000e+00> : vector<16x4xf32>
    %52 = tpu.matmul %49, %51, %cst_20 {dimension_numbers = #tpu.dot_dimension_numbers<[1], [1], [0], [0], [0, 0, 1, 0], [], []>} : vector<16x32xf32>, vector<4x32xf32>, vector<16x4xf32> -> vector<16x4xf32>
    %53 = vector.broadcast %50 : vector<1x4xf32> to vector<16x4xf32>
    %54 = arith.addf %52, %53 : vector<16x4xf32>
    %55 = math.tanh %54 : vector<16x4xf32>
    %c0_21 = arith.constant 0 : index
    %c0_22 = arith.constant 0 : index
    %56 = vector.load %arg7[%c0_21, %c0_22] : memref<16x4xf32, #tpu.memory_space<vmem>>, vector<16x4xf32>
    tpu.vector_store %arg7[%c0_21, %c0_22], %55 {strides = array<i32>} : memref<16x4xf32, #tpu.memory_space<vmem>>, vector<16x4xf32>,
    return
  }
  func.func @transform_0(%arg0: i32) -> (i32, i32) {
    %c0_i32 = arith.constant 0 : i32
    %c0_i32_0 = arith.constant 0 : i32
    return %arg0, %c0_i32 : i32, i32
  }
  func.func @transform_1(%arg0: i32) -> (i32, i32) {
    %c0_i32 = arith.constant 0 : i32
    %c0_i32_0 = arith.constant 0 : i32
    %c0_i32_1 = arith.constant 0 : i32
    return %c0_i32, %c0_i32_0 : i32, i32
  }
  func.func @transform_2(%arg0: i32) -> (i32, i32) {
    %c0_i32 = arith.constant 0 : i32
    %c0_i32_0 = arith.constant 0 : i32
    %c0_i32_1 = arith.constant 0 : i32
    return %c0_i32, %c0_i32_0 : i32, i32
  }
  func.func @transform_3(%arg0: i32) -> (i32, i32) {
    %c0_i32 = arith.constant 0 : i32
    %c0_i32_0 = arith.constant 0 : i32
    %c0_i32_1 = arith.constant 0 : i32
    return %c0_i32, %c0_i32_0 : i32, i32
  }
  func.func @transform_4(%arg0: i32) -> (i32, i32) {
    %c0_i32 = arith.constant 0 : i32
    %c0_i32_0 = arith.constant 0 : i32
    %c0_i32_1 = arith.constant 0 : i32
    return %c0_i32, %c0_i32_0 : i32, i32
  }
  func.func @transform_5(%arg0: i32) -> (i32, i32) {
    %c0_i32 = arith.constant 0 : i32
    %c0_i32_0 = arith.constant 0 : i32
    %c0_i32_1 = arith.constant 0 : i32
    return %c0_i32, %c0_i32_0 : i32, i32
  }
  func.func @transform_6(%arg0: i32) -> (i32, i32) {
    %c0_i32 = arith.constant 0 : i32
    %c0_i32_0 = arith.constant 0 : i32
    return %arg0, %c0_i32 : i32, i32
  }
}

</mosaic_0001>

<bundles_post_ra>
// kernel: tpu_custom_call.1
= control target key start
LH: loop header
LB: loop body
LE: loop exit
PB: predicated region body
PF: predicated region fallthrough
CT: control target
= control target key end

     0   :  { %11 = vsyncpa [#allocation3], 0  ;;  %s1860_s0 = inlined_call_operand.vmem [shape: f32[20,16], index: 0, kind: input, shape index: {}]   ;;  %s1861_s1 = inlined_call_operand.vmem [shape: f32[16,32], index: 1, kind: input, shape index: {}]   ;;  %s1862_s2 = inlined_call_operand.vmem [shape: f32[32,32], index: 2, kind: input, shape index: {}]   ;;  %s1863_s3 = inlined_call_operand.hbm [shape: f32[4,32], index: 3, kind: input, shape index: {}]   ;;  %s1864_s4 = inlined_call_operand.hbm [shape: f32[8,32], index: 4, kind: input, shape index: {}]   ;;  %s1865_s5 = inlined_call_operand.vmem [shape: f32[4,1], index: 5, kind: input, shape index: {}]   ;;  %s1866_s6 = inlined_call_operand.vmem [shape: f32[20,4], index: 6, kind: output, shape index: {}]  }
   0x1   :  { %12 = vsyncpa [#allocation5], 0  ;;  %s1654_s21 = smov 0   ;;  %s1656_s22 = smov 0  }
   0x2   :  { %s1658_s23 = smov 0  }
   0x3 LB: > { %s1667_s5 = sadd.s32 4294967295, %s1582_s23   ;;  %s1669_s24 = sadd.s32 1, %s1582_s23   ;;  %s1582_s23 = sphi %s1658_s23, %s1880_s23   ;;  %s1578_s22 = sphi %s1656_s22, %s1879_s22   ;;  %s1574_s21 = sphi %s1654_s21, %s1878_s21  }
   0x4   : > { %s153_s25 = ssub.s32 %s1582_s23, %s1669_s24  ;;  %s156_s26 = sadd.s32 1, %s1578_s22 }
   0x5   : > { %p154_p0 = scmp.eq.s32.totalorder %s153_s25, 0  ;;  %p166_p1 = scmp.ne.s32.totalorder %s1578_s22, %s1574_s21 }
   0x6   : > { %p167_p2 = scmp.eq.s32.totalorder %s1667_s5, 1  ;;  %p1197_p3 = scmp.ge.s32.totalorder %s1582_s23, 1 }
   0x7   : > { %s1677_s27 = scalar_select %p154_p0, %s1578_s22, %s156_s26  }
   0x8   : > { %p1679_p4 = por %p167_p2, %p166_p1  ;;  %p180_p5 = scmp.lt.s32.totalorder %s1582_s23, 3 }
   0x9   : > { %p1867_p6 = scmp.eq.s32.totalorder %s1667_s5, 0  ;;  %s1616_s30 = smov [#allocation2]  }
   0xa   : > { %s1869_s28 = scalar_select %p1679_p4, 1, 0 }
   0xb   : > { %p1684_p7 = pnand %p1197_p3, %p180_p5  ;;  %s199_s7 = sshll.u32 %s1616_s30, 4  ;;  %s200_s7 = int_to_ptr.vmem [resolvable:$true] %s199_s7 }
   0xc   : > { %s1617_s8 = smov [#allocation4]   ;;  %s1479_s11 = scalar_lea.vmem %s200_s7, 64 }
   0xd   : > { %s1870_s29 = scalar_select %p1684_p7, 1, 0 }
   0xe   : > { %p1354_p8 = pneg %p1684_p7  ;;  %s210_s9 = sshll.u32 %s1617_s8, 4  ;;  %s211_s9 = int_to_ptr.vmem [resolvable:$true] %s210_s9 }
   0xf   : > { %p1480_p11 = scmp.ne.s32.totalorder %s200_s7, %s1479_s11  ;;  %p1487_p0 = scmp.lt.s32.totalorder %s200_s7, %s200_s7 }
  0x10   : > { %p1692_p9 = pnand %p1867_p6, %p1354_p8  ;;  %p1488_p1 = scmp.lt.s32.totalorder %s1479_s11, %s1479_s11 }
  0x12   : > { %p1470_p10 = pneg %p1692_p9  ;;  %p1489_p2 = por %p1488_p1, %p1487_p0 }
  0x14   : > { %p1482_p12 = pnand %p1480_p11, %p1470_p10 }
  0x16   : > { %p1483_p13 = pneg %p1482_p12 }
  0x18   : > { %p1490_p3 = pnand %p1489_p2, %p1483_p13 }
  0x1a   : > { %1493 = shalt.err (!%p1490_p3)
}
  0x1b   : > { %1357 = dma.hbm_to_vmem [thread:$0]  (!%p1692_p9), %s1863_s3, 64, %s200_s7, [#allocation3]  }
  0x1c   : > { %s1505_s14 = scalar_lea.vmem %s211_s9, 128  ;;  %p1513_p11 = scmp.lt.s32.totalorder %s211_s9, %s211_s9 }
  0x1d   : > { %p1506_p5 = scmp.ne.s32.totalorder %s211_s9, %s1505_s14  ;;  %p1514_p12 = scmp.lt.s32.totalorder %s1505_s14, %s1505_s14 }
  0x1f   : > { %p1508_p8 = pnand %p1506_p5, %p1470_p10  ;;  %p1515_p4 = por %p1514_p12, %p1513_p11 }
  0x21   : > { %p1509_p6 = pneg %p1508_p8 }
  0x23   : > { %p1516_p7 = pnand %p1515_p4, %p1509_p6 }
  0x25   : > { %1519 = shalt.err (!%p1516_p7)
}
  0x26   : > { %1360 = dma.hbm_to_vmem [thread:$0]  (!%p1692_p9), %s1864_s4, 128, %s211_s9, [#allocation5]  }
  0x27   : > { %p1872_p13 = scmp.ne.s32.totalorder %s1870_s29, 0 }
  0x28   : > { %p1873_p0 = scmp.eq.s32.totalorder (!%p1872_p13), %s1667_s5, 0 }
  0x29   : > { %243 = sbr.rel (%p1872_p13) target bundleno = 1154 (0x482), region = 44 }
  0x2e   : > { %1565 = dma.done.wait (%p1873_p0), [#allocation3], 64   ;;  %p1874_p10 = pmov %p1873_p0 }
  0x2f   : > { %p1875_p1 = pmov %p1873_p0 }
  0x30   : > { %1567 = vsyncadd (%p1874_p10), [#allocation3], 4294967232 }
  0x31   : > { %1569 = dma.done.wait (%p1875_p1), [#allocation5], 128   ;;  %p1876_p4 = pmov %p1873_p0 }
  0x32   : > { %s1725_s17 = sshll.u32 %s1667_s5, 1  ;;  %v1618_v0 = vmov 0.03125   ;;  %vm308_vm0 = vcmask 130048   ;;  %v303_v1 = vld [vmem:[%s1861_s1 + $0x8] sm:$0xff]  ;;  %v302_v2 = vld [vmem:[%s1861_s1] sm:$0xff]  ;;  %v304_v5 = vlaneseq  ;;  %vm390_vm1 = vcmask 261120  }
  0x33   : > { %1571 = vsyncadd (%p1876_p4), [#allocation5], 4294967168  ;;  %p285_p6 = scmp.lt.s32.totalorder %s1725_s17, 2  ;;  %1286 = vmatprep.subr.mxu1 %v1618_v0  ;;  %1279 = vmatprep.subr.mxu0 %v303_v1  ;;  %v1758_v8 = vld [vmem:[#allocation4] sm:$0xff]  ;;  %v584_v16 = vld [vmem:[%s1862_s2 + $0x18] sm:$0xff]  ;;  %s277_s16 = sand.u32 1, %s1574_s21  }
  0x34   : > { %1287 = vmatpush3.msra.mxu1 %v1618_v0  ;;  %1280 = vmatpush3.msra.mxu0 %v303_v1  ;;  %v1755_v6 = vshrl.u32 %v304_v5, 7  ;;  %v583_v17 = vld [vmem:[%s1862_s2 + $0x10] sm:$0xff]  ;;  %v582_v18 = vld [vmem:[%s1862_s2 + $0x8] sm:$0xff]  ;;  %v581_v19 = vld [vmem:[%s1862_s2] sm:$0xff]  ;;  %vm951_vm2 = vcmask 31744   ;;  %p1877_p7 = scmp.ne.s32.totalorder %s1869_s28, 0 }
  0x35   : > { %s286_s18 = scalar_select %p285_p6, %s1725_s17, 2  ;;  %1288 = vmatprep.subr.mxu1 %v1618_v0  ;;  %1281 = vmatprep.subr.mxu0 %v302_v2  ;;  %v860_v54 = vld [vmem:[#allocation2] sm:$0xf] }
  0x36   : > { %1289 = vmatpush3.msra.mxu1 %v1618_v0  ;;  %1282 = vmatpush3.msra.mxu0 %v302_v2  ;;  %v306_v7 = vsub.s32 0, %v1755_v6  ;;  %v569_v30 = vsub.s32 1, %v1755_v6  ;;  %v575_v31 = vsub.s32 2, %v1755_v6  ;;  %v587_v46 = vsub.s32 3, %v1755_v6  ;;  %s962_s20 = ssub.s32 (%p1877_p7), 3, %s1725_s17  ;;  %s1239_s23 = sshll.u32 (%p1877_p7), %s1667_s5, 4 }
  0x37   : > { %s1206_s19 = sshll.u32 %s286_s18, 3  ;;  %1290 = vmatprep.subr.mxu1 %v1618_v0  ;;  %1297 = vmatprep.subr.mxu0 %v1618_v0  ;;  %v848_v1 = vsub.s32 4, %v1755_v6  ;;  %v854_v2 = vsub.s32 5, %v1755_v6  ;;  %s1204_s18 = sshll.u32 %s277_s16, 4 }
  0x38   : > { %s288_s25 = scalar_lea.vmem %s1860_s0, %s1206_s19  ;;  %1291 = vmatpush3.msra.mxu1 %v1618_v0  ;;  %v307_v9 = vrot.slane %v1758_v8, %v306_v7  ;;  %v570_v33 = vrot.slane %v1758_v8, %v569_v30  ;;  %v576_v38 = vrot.slane %v1758_v8, %v575_v31  ;;  %v588_v47 = vrot.slane %v1758_v8, %v587_v46  ;;  %s1815_s19 = scalar_lea.vmem [#allocation6], %s1204_s18  }
  0x39   : > { %v300_v3 = vld [vmem:[%s288_s25] sm:$0xff]  ;;  %1292 = vmatprep.subr.mxu1 %v1618_v0  ;;  %v301_v4 = vld [vmem:[%s288_s25 + $0x8] sm:$0xff]  ;;  %p963_p9 = scmp.lt.s32.totalorder (%p1877_p7), %s962_s20, 2  ;;  %s1826_s26 = scalar_lea.vmem (%p1877_p7), %s1866_s6, %s1239_s23  }
  0x3a   : > { %1283 = vmatprep.mubr.msk.f32.mxu0 %vm308_vm0, %v300_v3  ;;  %1293 = vmatpush3.msra.mxu1 %v1618_v0 }
  0x3b   : > { %1284 = vmatmul.mubr.msk.f32.vlgmr.msra.gmra.mxu0 %vm308_vm0, %v301_v4  ;;  %1308 = vmatprep.subr.mxu1 %v584_v16  ;;  %v849_v4 = vrot.slane %v1758_v8, %v848_v1 }
  0x3c   : > { %1298 = vmatpush3.msra.mxu0 %v1618_v0 }
  0x3d   : > { %1299 = vmatprep.subr.mxu0 %v1618_v0 }
  0x3e   : > { %1300 = vmatpush3.msra.mxu0 %v1618_v0 }
  0x3f   : > { %1301 = vmatprep.subr.mxu0 %v1618_v0 }
  0x40   : > { %1302 = vmatpush3.msra.mxu0 %v1618_v0 }
  0x41   : > { %1303 = vmatprep.subr.mxu0 %v1618_v0 }
  0x42   : > { %1304 = vmatpush3.msra.mxu0 %v1618_v0 }
  0x43   : > { %1319 = vmatprep.subr.mxu0 %v1618_v0 }
  0xfb   : > { %v1285_v10 = vpop.f32.mrf.mxu0 }
  0xfc   : > { %v387_v11 = vadd.f32 %v1285_v10, %v307_v9 }
  0xfd   : > { %v381_v12 = vpop.f32.mrf.mxu0 }
  0xfe   : > { %v382_v13 = vadd.f32 %v381_v12, %v307_v9  ;;  %v473_v15 = vmul.f32 %v387_v11, %v387_v11 }
 0x100   : > { %v472_v14 = vmul.f32 %v382_v13, %v382_v13  ;;  %1294 = vmatprep.mubr.msk.f32.mxu1 %vm390_vm1, %v382_v13 }
 0x101   : > { %1295 = vmatmul.mubr.msk.f32.vlgmr.msra.gmra.mxu1 %vm390_vm1, %v387_v11 }
 0x102   : > { %1305 = vmatprep.mubr.msk.f32.mxu0 %vm390_vm1, %v472_v14  ;;  %1309 = vmatpush3.msra.mxu1 %v584_v16 }
 0x103   : > { %1306 = vmatmul.mubr.msk.f32.vlgmr.msra.gmra.mxu0 %vm390_vm1, %v473_v15  ;;  %1310 = vmatprep.subr.mxu1 %v583_v17 }
 0x104   : > { %1320 = vmatpush3.msra.mxu0 %v1618_v0  ;;  %1311 = vmatpush3.msra.mxu1 %v583_v17 }
 0x105   : > { %1321 = vmatprep.subr.mxu0 %v1618_v0  ;;  %1312 = vmatprep.subr.mxu1 %v582_v18 }
 0x106   : > { %1322 = vmatpush3.msra.mxu0 %v1618_v0  ;;  %1313 = vmatpush3.msra.mxu1 %v582_v18 }
 0x107   : > { %1323 = vmatprep.subr.mxu0 %v1618_v0  ;;  %1314 = vmatprep.subr.mxu1 %v581_v19 }
 0x108   : > { %1324 = vmatpush3.msra.mxu0 %v1618_v0  ;;  %1315 = vmatpush3.msra.mxu1 %v581_v19  ;;  %v863_v19 = vsub.s32 6, %v1755_v6 }
 0x109   : > { %1325 = vmatprep.subr.mxu0 %v1618_v0  ;;  %1330 = vmatprep.subr.mxu1 %v1618_v0 }
 0x10a   : > { %1326 = vmatpush3.msra.mxu0 %v1618_v0 }
 0x10b   : > { %1341 = vmatprep.subr.msk.mxu0 %vm390_vm1, %v860_v54 }
 0x1c1   : > { %v1296_v20 = vpop.f32.mrf.mxu1 }
 0x1c2   : > { %v556_v21 = vmul.f32 %v1296_v20, %v1296_v20  ;;  %v560_v32 = vsub.f32 %v387_v11, %v1296_v20  ;;  %v855_v11 = vrot.slane %v1758_v8, %v854_v2  ;;  %v864_v20 = vrot.slane %v1758_v8, %v863_v19 }
 0x1c3   : > { %v463_v22 = vpop.f32.mrf.mxu1  ;;  %v1307_v23 = vpop.f32.mrf.mxu0 }
 0x1c4   : > { %v555_v24 = vmul.f32 %v463_v22, %v463_v22  ;;  %v558_v25 = vsub.f32 %v1307_v23, %v556_v21  ;;  %v559_v35 = vsub.f32 %v382_v13, %v463_v22 }
 0x1c5   : > { %v546_v26 = vpop.f32.mrf.mxu0 }
 0x1c6   : > { %v562_v27 = vadd.f32 1e-05, %v558_v25  ;;  %v557_v28 = vsub.f32 %v546_v26, %v555_v24 }
 0x1c8   : > { %1456 = vrsqrt.f32 %v562_v27  ;;  %v561_v29 = vadd.f32 1e-05, %v557_v28 }
 0x1ca   : > { %1458 = vrsqrt.f32 %v561_v29 }
 0x1d5   : > { %v1457_v34 = vpop.eup %1456 }
 0x1d6   : > { %v566_v36 = vmul.f32 %v1457_v34, %v560_v32 }
 0x1d7   : > { %v1459_v37 = vpop.eup %1458 }
 0x1d8   : > { %v565_v39 = vmul.f32 %v1459_v37, %v559_v35  ;;  %v572_v40 = vmul.f32 %v570_v33, %v566_v36 }
 0x1da   : > { %v571_v41 = vmul.f32 %v570_v33, %v565_v39  ;;  %v578_v42 = vadd.f32 %v576_v38, %v572_v40 }
 0x1dc   : > { %v577_v43 = vadd.f32 %v576_v38, %v571_v41  ;;  %v580_v45 = vmax.f32 %v578_v42, 0.0 }
 0x1de   : > { %v579_v44 = vmax.f32 %v577_v43, 0.0 }
 0x1e0   : > { %1316 = vmatprep.mubr.msk.f32.mxu1 %vm390_vm1, %v579_v44 }
 0x1e1   : > { %1317 = vmatmul.mubr.msk.f32.vlgmr.msra.gmra.mxu1 %vm390_vm1, %v580_v45 }
 0x1e2   : > { %1331 = vmatpush3.msra.mxu1 %v1618_v0 }
 0x1e3   : > { %1332 = vmatprep.subr.mxu1 %v1618_v0 }
 0x1e4   : > { %1333 = vmatpush3.msra.mxu1 %v1618_v0 }
 0x1e5   : > { %1334 = vmatprep.subr.mxu1 %v1618_v0 }
 0x1e6   : > { %1335 = vmatpush3.msra.mxu1 %v1618_v0 }
 0x1e7   : > { %1336 = vmatprep.subr.mxu1 %v1618_v0 }
 0x1e8   : > { %1337 = vmatpush3.msra.mxu1 %v1618_v0 }
 0x2a1   : > { %v1318_v48 = vpop.f32.mrf.mxu1 }
 0x2a2   : > { %v667_v49 = vadd.f32 %v1318_v48, %v588_v47 }
 0x2a3   : > { %v661_v50 = vpop.f32.mrf.mxu1 }
 0x2a4   : > { %v662_v51 = vadd.f32 %v661_v50, %v588_v47  ;;  %v752_v53 = vmul.f32 %v667_v49, %v667_v49 }
 0x2a6   : > { %v751_v52 = vmul.f32 %v662_v51, %v662_v51  ;;  %1327 = vmatprep.mubr.msk.f32.mxu0 %vm390_vm1, %v662_v51 }
 0x2a7   : > { %1328 = vmatmul.mubr.msk.f32.vlgmr.msra.gmra.mxu0 %vm390_vm1, %v667_v49 }
 0x2a8   : > { %1338 = vmatprep.mubr.msk.f32.mxu1 %vm390_vm1, %v751_v52  ;;  %1342 = vmatpush3.xpose.msk.msra.mxu0 %vm390_vm1, %v860_v54 }
 0x2a9   : > { %1339 = vmatmul.mubr.msk.f32.vlgmr.msra.gmra.mxu1 %vm390_vm1, %v752_v53 }
 0x367   : > { %v1329_v55 = vpop.f32.mrf.mxu0 }
 0x368   : > { %v835_v56 = vmul.f32 %v1329_v55, %v1329_v55  ;;  %v839_v3 = vsub.f32 %v667_v49, %v1329_v55 }
 0x369   : > { %v742_v57 = vpop.f32.mrf.mxu0  ;;  %v1340_v58 = vpop.f32.mrf.mxu1 }
 0x36a   : > { %v834_v59 = vmul.f32 %v742_v57, %v742_v57  ;;  %v837_v60 = vsub.f32 %v1340_v58, %v835_v56  ;;  %v838_v7 = vsub.f32 %v662_v51, %v742_v57 }
 0x36b   : > { %v825_v61 = vpop.f32.mrf.mxu1 }
 0x36c   : > { %v841_v62 = vadd.f32 1e-05, %v837_v60  ;;  %v836_v63 = vsub.f32 %v825_v61, %v834_v59 }
 0x36e   : > { %1460 = vrsqrt.f32 %v841_v62  ;;  %v840_v0 = vadd.f32 1e-05, %v836_v63 }
 0x370   : > { %1462 = vrsqrt.f32 %v840_v0 }
 0x37b   : > { %v1461_v5 = vpop.eup %1460 }
 0x37c   : > { %v845_v9 = vmul.f32 %v1461_v5, %v839_v3 }
 0x37d   : > { %v1463_v10 = vpop.eup %1462 }
 0x37e   : > { %v844_v12 = vmul.f32 %v1463_v10, %v838_v7  ;;  %v851_v13 = vmul.f32 %v849_v4, %v845_v9 }
 0x380   : > { %v850_v14 = vmul.f32 %v849_v4, %v844_v12  ;;  %v857_v15 = vadd.f32 %v855_v11, %v851_v13 }
 0x382   : > { %v856_v16 = vadd.f32 %v855_v11, %v850_v14  ;;  %v859_v18 = vmax.f32 %v857_v15, 0.0 }
 0x384   : > { %v858_v17 = vmax.f32 %v856_v16, 0.0 }
 0x386   : > { %1343 = vmatprep.mubr.msk.f32.mxu0 %vm390_vm1, %v858_v17 }
 0x387   : > { %1344 = vmatmul.mubr.msk.f32.vlgmr.msra.gmra.mxu0 %vm390_vm1, %v859_v18 }
 0x447   : > { %v1345_v21 = vpop.f32.mrf.mxu0 }
 0x448   : > { %v946_v22 = vadd.f32 %v1345_v21, %v864_v20 }
 0x449   : > { %v940_v23 = vpop.f32.mrf.mxu0 }
 0x44a   : > { %1464 = vtanh.f32 %v946_v22  ;;  %v941_v24 = vadd.f32 %v940_v23, %v864_v20 }
 0x44c   : > { %1466 = vtanh.f32 %v941_v24 }
 0x456   : > { %960 = sbr.rel (!%p1877_p7) target bundleno = 1154 (0x482), region = 56 }
 0x457   : > { %v1465_v25 = vpop.eup %1464 }
 0x458   : > { %953 = vst.msk [vmem:[%s1815_s19 + $0x8] sm:$0xff] %vm951_vm2, %v1465_v25 }
 0x459   : > { %v1467_v26 = vpop.eup %1466 }
 0x45a   : > { %952 = vst.msk [vmem:[%s1815_s19] sm:$0xff] %vm951_vm2, %v1467_v26 }
 0x45b   : > { %s1882_s20 = smov (!%p963_p9, %s962_s20), 2 }
 0x45c   : > { %s1224_s29 = sshll.u32 %s1882_s20, 7 }
 0x45d   : > { %p1227_p2 = scmp.eq.s32.totalorder %s1224_s29, 0 }
 0x45e   : > { %s1832_s30 = sshrl.u32 (!%p1227_p2), %s1882_s20, 1 }
 0x45f   : > { %971 = sbr.rel (%p1227_p2) target bundleno = 1154 (0x482), region = 60  ;;  %p1228_p3 = scmp.le.s32.totalorder (!%p1227_p2), %s1832_s30, 0 }
 0x464   : > { %1134 = sbr.rel (%p1228_p3) target bundleno = 1137 (0x471), region = 137  ;;  %s1584_s5 = smov (!%p1228_p3), %s1826_s26  }
 0x465   : > { %s1588_s28 = smov (!%p1228_p3), %s1815_s19   ;;  %s1592_s17 = smov (!%p1228_p3), 0  }
 0x466   : > { %s1596_s7 = smov (!%p1228_p3), 0  }
 0x469 LB: >> { %v1036_v6 = vld [vmem:[%s1590_s28] sm:$0xff]  ;;  %v1038_v8 = vld [vmem:[%s1590_s28 + $0x8] sm:$0xff]  ;;  %s1040_s8 = sadd.s32 1, %s1594_s17  ;;  %s1030_s7 = sadd.s32 1, %s1598_s7   ;;  %s1598_s7 = sphi %s1596_s7, %s1030_s7   ;;  %s1594_s17 = sphi %s1592_s17, %s1593_s17   ;;  %s1590_s28 = sphi %s1588_s28, %s1045_s28   ;;  %s1586_s5 = sphi %s1584_s5, %s1046_s5  }
 0x46a   : >> { %1037 = vst [vmem:[%s1586_s5] sm:$0xff] %v1036_v6  ;;  %1039 = vst [vmem:[%s1586_s5 + $0x8] sm:$0xff] %v1038_v8  ;;  %p1041_p5 = scmp.ge.s32.totalorder %s1040_s8, %s1832_s30  ;;  %p1029_p8 = scmp.ge.s32.totalorder %s1030_s7, %s1832_s30 }
 0x46c   : >> { %s1884_s8 = smov (%p1041_p5, %s1040_s8), 0  ;;  %1032 = sbr.rel (!%p1029_p8) target bundleno = 1129 (0x469), region = 143 }
 0x46d   : >> { %s1229_s9 = sshll.u32 %s1884_s8, 4  ;;  %s1593_s17 = smov %s1884_s8  }
 0x46e   : >> { %s1045_s28 = scalar_lea.vmem %s1815_s19, %s1229_s9 [#allocation6]   ;;  %s1046_s5 = scalar_lea.vmem %s1826_s26, %s1229_s9  }
 0x471 PF: > { %s1842_s10 = sand.u32 1, %s1882_s20   ;;  %s1240_s11 = sshll.u32 %s1832_s30, 4 }
 0x472   : > { %s1051_s12 = scalar_lea.vmem %s1815_s19, %s1240_s11 [#allocation6]   ;;  %s1053_s13 = scalar_lea.vmem %s1826_s26, %s1240_s11  }
 0x473   : > { %p1234_p11 = scmp.le.s32.totalorder %s1842_s10, 0 }
 0x474   : > { %s1600_s14 = smov (!%p1234_p11), %s1053_s13   ;;  %s1604_s15 = smov (!%p1234_p11), %s1051_s12  }
 0x475   : > { %1148 = sbr.rel (%p1234_p11) target bundleno = 1154 (0x482), region = 148  ;;  %s1608_s16 = smov (!%p1234_p11), 0  }
 0x476   : > { %s1612_s18 = smov (!%p1234_p11), 0  }
 0x47a LB: >> { %v1063_v27 = vld [vmem:[%s1606_s15] sm:$0xff]  ;;  %s1065_s20 = sadd.s32 1, %s1610_s16  ;;  %s1057_s18 = sadd.s32 1, %s1614_s18   ;;  %s1614_s18 = sphi %s1612_s18, %s1057_s18   ;;  %s1610_s16 = sphi %s1608_s16, %s1609_s16   ;;  %s1606_s15 = sphi %s1604_s15, %s1070_s15   ;;  %s1602_s14 = sphi %s1600_s14, %s1071_s14  }
 0x47b   : >> { %1064 = vst [vmem:[%s1602_s14] sm:$0xff] %v1063_v27  ;;  %p1066_p12 = scmp.ge.s32.totalorder %s1065_s20, %s1842_s10  ;;  %p1056_p13 = scmp.ge.s32.totalorder %s1057_s18, %s1842_s10 }
 0x47d   : >> { %s1886_s20 = smov (%p1066_p12, %s1065_s20), 0  ;;  %1059 = sbr.rel (!%p1056_p13) target bundleno = 1146 (0x47a), region = 154 }
 0x47e   : >> { %s1235_s19 = sshll.u32 %s1886_s20, 3  ;;  %s1609_s16 = smov %s1886_s20  }
 0x47f   : >> { %s1070_s15 = scalar_lea.vmem %s1051_s12, %s1235_s19 [#allocation6]   ;;  %s1071_s14 = scalar_lea.vmem %s1053_s13, %s1235_s19  }
 0x482 PF: > { %p15_p0 = scmp.ge.s32.totalorder %s1669_s24, 4   ;;  %s1878_s21 = smov %s1578_s22 }
 0x483   : > { %s1879_s22 = smov %s1677_s27  ;;  %s1880_s23 = smov %s1669_s24 }
 0x484   :  { %17 = sbr.rel (!%p15_p0) target bundleno = 3 (0x3), region = 165 }
 0x489   :  { %1087 = vsyncpa [#allocation3], 1 }
 0x48a   :  { %1089 = vsyncpa [#allocation3 + $0x1], 1 }
 0x48b   :  { %1090 = vsyncpa [#allocation5], 1 }

</bundles_post_ra>
